<compile_context>
chip_gen: v7x
topology: tpu7x:2x2x1
jax: 0.10.0
libtpu: 0.0.40
codegen_flags: <defaults>
</compile_context>

<pallas_src>
import math
import functools

import jax
import jax.numpy as jnp
from jax import lax
from jax.experimental import pallas as pl
from jax.experimental.pallas import tpu as pltpu


def _mha_kernel(q_ref, k_ref, v_ref,
                wq_ref, bq_ref, wk_ref, bk_ref,
                wv_ref, bv_ref, wo_ref, bo_ref,
                o_ref,
                k_scr, v_scr, ctx_scr,
                *, num_heads, d_k):
    f32 = jnp.float32
    bf16 = jnp.bfloat16
    inv_sqrt_dk = 1.0 / math.sqrt(d_k)

    # ---- K/V projections: once per batch (q-tile 0), kept in VMEM scratch ----
    @pl.when(pl.program_id(1) == 0)
    def _():
        xk = k_ref[...].astype(bf16)                    # (S_kv, D)
        xv = v_ref[...].astype(bf16)
        K = jnp.dot(xk, wk_ref[...], preferred_element_type=f32) + bk_ref[...]
        V = jnp.dot(xv, wv_ref[...], preferred_element_type=f32) + bv_ref[...]
        k_scr[...] = K.astype(bf16)
        v_scr[...] = V.astype(bf16)

    # ---- Q projection for this query tile (bf16 MXU operands, fp32 accum) ----
    xq = q_ref[...].astype(bf16)                        # (TQ, D)
    Q = jnp.dot(xq, wq_ref[...], preferred_element_type=f32) + bq_ref[...]
    # Fold 1/sqrt(d_k) into Q before the score matmul.
    Qs = (Q * inv_sqrt_dk).astype(bf16)                 # (TQ, D)

    Kb = k_scr[...]                                     # (S_kv, D) bf16
    Vb = v_scr[...]                                     # (S_kv, D) bf16

    # ---- Per-head attention as clean 2-D MXU matmuls (static head loop) ----
    for h in range(num_heads):
        lo = h * d_k
        q_h = Qs[:, lo:lo + d_k]                        # (TQ,   d_k)
        k_h = Kb[:, lo:lo + d_k]                        # (S_kv, d_k)
        v_h = Vb[:, lo:lo + d_k]                        # (S_kv, d_k)

        # scores[q, k] = q_h . k_h (contract d_k), fp32 accumulation on MXU.
        s = lax.dot_general(q_h, k_h, (((1,), (1,)), ((), ())),
                            preferred_element_type=f32)         # (TQ, S_kv)

        # TODO(synk): optional attention mask of the PyTorch forward is not
        # implemented; this is the default mask=None path.

        # Numerically-stable softmax; statistics stay fp32.
        m = jnp.max(s, axis=-1, keepdims=True)
        e = jnp.exp(s - m)                                       # (TQ, S_kv)
        denom = jnp.sum(e, axis=-1, keepdims=True)               # (TQ, 1)

        # Deferred normalization: matmul with un-normalized probs, scale the
        # small (TQ, d_k) context by the EUP reciprocal of the denominator.
        ctx_h = jnp.dot(e.astype(bf16), v_h, preferred_element_type=f32)
        ctx_h = ctx_h * pl.reciprocal(denom, approx=True)        # (TQ, d_k)
        ctx_scr[:, lo:lo + d_k] = ctx_h.astype(bf16)

    # ---- Output projection (bf16 operands, fp32 accumulate) ----
    out = jnp.dot(ctx_scr[...], wo_ref[...], preferred_element_type=f32) + bo_ref[...]
    o_ref[...] = out.astype(o_ref.dtype)


def _vmem_limit_and_tile_cap():
    """Generation-dependent VMEM budget and query-tile cap."""
    try:
        vmem_cap = pltpu.get_tpu_info().vmem_capacity_bytes
    except Exception:
        vmem_cap = 64 * 1024 * 1024
    if vmem_cap >= 128 * 1024 * 1024:          # v5e / v6e: 128 MiB VMEM
        return 100 * 1024 * 1024, 1024
    return 48 * 1024 * 1024, 256               # v7x: 64 MiB VMEM


def _pick_q_tile(s_q, cap):
    """Largest multiple-of-8 divisor of s_q up to `cap` (else the full seq)."""
    if s_q <= cap:
        return s_q
    for cand in (1024, 512, 256, 128, 64, 32, 16, 8):
        if cand <= cap and s_q % cand == 0:
            return cand
    return s_q


def multi_head_attention(q, k, v, params, num_heads, q_tile=None):
    """q, k, v: [B, S, D] float32.  params: transposed weights + [1, D] biases."""
    B, S_q, D = q.shape
    _, S_kv, _ = k.shape
    d_k = D // num_heads

    vmem_limit, tile_cap = _vmem_limit_and_tile_cap()
    if q_tile is None:
        q_tile = _pick_q_tile(S_q, tile_cap)
    num_q_tiles = S_q // q_tile

    bf16 = jnp.bfloat16
    # Weights go in as bf16 (halves DMA bytes + VMEM); biases stay fp32.
    wq = params["wq_t"].astype(bf16)
    wk = params["wk_t"].astype(bf16)
    wv = params["wv_t"].astype(bf16)
    wo = params["wo_t"].astype(bf16)

    kernel = functools.partial(_mha_kernel, num_heads=num_heads, d_k=d_k)

    q_spec = pl.BlockSpec((pl.Squeezed(), q_tile, D), lambda b, t: (b, t, 0))
    kv_spec = pl.BlockSpec((pl.Squeezed(), S_kv, D), lambda b, t: (b, 0, 0))
    # Constant index_map -> DMA'd once; single-buffer them to halve VMEM use.
    w_spec = pl.BlockSpec((D, D), lambda b, t: (0, 0),
                          pipeline_mode=pl.Buffered(1))
    b_spec = pl.BlockSpec((1, D), lambda b, t: (0, 0),
                          pipeline_mode=pl.Buffered(1))

    return pl.pallas_call(
        kernel,
        out_shape=jax.ShapeDtypeStruct((B, S_q, D), q.dtype),
        grid_spec=pltpu.PrefetchScalarGridSpec(
            num_scalar_prefetch=0,
            grid=(B, num_q_tiles),
            in_specs=[q_spec, kv_spec, kv_spec,
                      w_spec, b_spec,   # Wq, bq
                      w_spec, b_spec,   # Wk, bk
                      w_spec, b_spec,   # Wv, bv
                      w_spec, b_spec],  # Wo, bo
            out_specs=q_spec,
            scratch_shapes=[
                pltpu.VMEM((S_kv, D), bf16),    # projected K (per batch)
                pltpu.VMEM((S_kv, D), bf16),    # projected V (per batch)
                pltpu.VMEM((q_tile, D), bf16),  # per-tile context
            ],
        ),
        compiler_params=pltpu.CompilerParams(
            # q-tile axis must be sequential ("arbitrary") so the K/V scratch
            # computed at tile 0 is valid for later tiles of the same batch.
            dimension_semantics=("parallel", "arbitrary"),
            vmem_limit_bytes=vmem_limit),
    )(q, k, v,
      wq, params["bq"],
      wk, params["bk"],
      wv, params["bv"],
      wo, params["bo"])


def _reference(q, k, v, params, num_heads):
    """Pure-JAX fp32 reference mirroring the PyTorch forward (mask=None)."""
    B, S_q, D = q.shape
    d_k = D // num_heads
    Q = q @ params["wq_t"] + params["bq"][0]
    K = k @ params["wk_t"] + params["bk"][0]
    V = v @ params["wv_t"] + params["bv"][0]
    Q = Q.reshape(B, S_q, num_heads, d_k).transpose(0, 2, 1, 3)
    K = K.reshape(B, -1, num_heads, d_k).transpose(0, 2, 1, 3)
    V = V.reshape(B, -1, num_heads, d_k).transpose(0, 2, 1, 3)
    scores = jnp.einsum('bhqd,bhkd->bhqk', Q, K) / math.sqrt(d_k)
    attn = jax.nn.softmax(scores, axis=-1)
    ctx = jnp.einsum('bhqk,bhkd->bhqd', attn, V)
    ctx = ctx.transpose(0, 2, 1, 3).reshape(B, S_q, D)
    return ctx @ params["wo_t"] + params["bo"][0]


if __name__ == "__main__":
    # Small shapes consistent with the module: batch=2, seq=8, d_model=32, heads=4.
    B, S, D, H = 2, 8, 32, 4

    key = jax.random.PRNGKey(0)
    ks = jax.random.split(key, 11)

    def lin(kw, kb):
        # nn.Linear-style init, stored transposed ([in, out]).
        bound = 1.0 / math.sqrt(D)
        w = jax.random.uniform(kw, (D, D), jnp.float32, -bound, bound)
        b = jax.random.uniform(kb, (1, D), jnp.float32, -bound, bound)
        return w, b

    wq_t, bq = lin(ks[0], ks[1])
    wk_t, bk = lin(ks[2], ks[3])
    wv_t, bv = lin(ks[4], ks[5])
    wo_t, bo = lin(ks[6], ks[7])
    params = dict(wq_t=wq_t, bq=bq, wk_t=wk_t, bk=bk,
                  wv_t=wv_t, bv=bv, wo_t=wo_t, bo=bo)

    q = jax.random.normal(ks[8], (B, S, D), jnp.float32)
    k = jax.random.normal(ks[9], (B, S, D), jnp.float32)
    v = jax.random.normal(ks[10], (B, S, D), jnp.float32)

    out = multi_head_attention(q, k, v, params, num_heads=H)
    out = jax.block_until_ready(out)

    ref = _reference(q, k, v, params, num_heads=H)
    assert out.shape == (B, S, D)
    # bf16 matmul operands (projections + attention) plus the approx EUP
    # reciprocal => looser tolerance than a pure-fp32 path.
    assert jnp.allclose(out, ref, atol=5e-2, rtol=5e-2), "mismatch vs reference"

    print("KERNEL_OK")
</pallas_src>

<mosaic_0001>
module attributes {stable_mosaic.version = 11 : i64} {
  func.func @_mha_kernel(%arg0: i32, %arg1: i32, %arg2: memref<1x8x32xf32, #tpu.memory_space<vmem>>, %arg3: memref<1x8x32xf32, #tpu.memory_space<vmem>>, %arg4: memref<1x8x32xf32, #tpu.memory_space<vmem>>, %arg5: memref<32x32xbf16, #tpu.memory_space<vmem>>, %arg6: memref<1x32xf32, #tpu.memory_space<vmem>>, %arg7: memref<32x32xbf16, #tpu.memory_space<vmem>>, %arg8: memref<1x32xf32, #tpu.memory_space<vmem>>, %arg9: memref<32x32xbf16, #tpu.memory_space<vmem>>, %arg10: memref<1x32xf32, #tpu.memory_space<vmem>>, %arg11: memref<32x32xbf16, #tpu.memory_space<vmem>>, %arg12: memref<1x32xf32, #tpu.memory_space<vmem>>, %arg13: memref<1x8x32xf32, #tpu.memory_space<vmem>>, %arg14: memref<8x32xbf16, #tpu.memory_space<vmem>>, %arg15: memref<8x32xbf16, #tpu.memory_space<vmem>>, %arg16: memref<8x32xbf16, #tpu.memory_space<vmem>>) attributes {dimension_semantics = [#tpu.dimension_semantics<parallel>, #tpu.dimension_semantics<arbitrary>], iteration_bounds = array<i64: 2, 1>, scalar_prefetch = 0 : i64, scratch_operands = 3 : i64, tpu.core_type = #tpu.core_type<tc>, window_params = [{transform_indices = @transform_0, window_bounds = array<i64: 1, 8, 32>}, {transform_indices = @transform_1, window_bounds = array<i64: 1, 8, 32>}, {transform_indices = @transform_2, window_bounds = array<i64: 1, 8, 32>}, {pipeline_mode = #tpu.pipeline_mode<synchronous>, transform_indices = @transform_3, window_bounds = array<i64: 32, 32>}, {pipeline_mode = #tpu.pipeline_mode<synchronous>, transform_indices = @transform_4, window_bounds = array<i64: 1, 32>}, {pipeline_mode = #tpu.pipeline_mode<synchronous>, transform_indices = @transform_5, window_bounds = array<i64: 32, 32>}, {pipeline_mode = #tpu.pipeline_mode<synchronous>, transform_indices = @transform_6, window_bounds = array<i64: 1, 32>}, {pipeline_mode = #tpu.pipeline_mode<synchronous>, transform_indices = @transform_7, window_bounds = array<i64: 32, 32>}, {pipeline_mode = #tpu.pipeline_mode<synchronous>, transform_indices = @transform_8, window_bounds = array<i64: 1, 32>}, {pipeline_mode = #tpu.pipeline_mode<synchronous>, transform_indices = @transform_9, window_bounds = array<i64: 32, 32>}, {pipeline_mode = #tpu.pipeline_mode<synchronous>, transform_indices = @transform_10, window_bounds = array<i64: 1, 32>}, {transform_indices = @transform_11, window_bounds = array<i64: 1, 8, 32>}]} {
    %c0_i32 = arith.constant 0 : i32
    %0 = arith.cmpi eq, %arg1, %c0_i32 : i32
    %1 = arith.extui %0 : i1 to i32
    %c0_i32_0 = arith.constant 0 : i32
    %2 = arith.cmpi ne, %1, %c0_i32_0 : i32
    scf.if %2 {
      %c0_43 = arith.constant 0 : index
      %c0_44 = arith.constant 0 : index
      %c0_45 = arith.constant 0 : index
      %97 = vector.load %arg3[%c0_43, %c0_44, %c0_45] : memref<1x8x32xf32, #tpu.memory_space<vmem>>, vector<1x8x32xf32>
      %98 = vector.shape_cast %97 : vector<1x8x32xf32> to vector<8x32xf32>
      %99 = arith.truncf %98 : vector<8x32xf32> to vector<8x32xbf16>
      %c0_46 = arith.constant 0 : index
      %c0_47 = arith.constant 0 : index
      %c0_48 = arith.constant 0 : index
      %100 = vector.load %arg4[%c0_46, %c0_47, %c0_48] : memref<1x8x32xf32, #tpu.memory_space<vmem>>, vector<1x8x32xf32>
      %101 = vector.shape_cast %100 : vector<1x8x32xf32> to vector<8x32xf32>
      %102 = arith.truncf %101 : vector<8x32xf32> to vector<8x32xbf16>
      %c0_49 = arith.constant 0 : index
      %c0_50 = arith.constant 0 : index
      %103 = vector.load %arg7[%c0_49, %c0_50] : memref<32x32xbf16, #tpu.memory_space<vmem>>, vector<32x32xbf16>
      %cst_51 = arith.constant dense<0.000000e+00> : vector<8x32xf32>
      %104 = tpu.matmul %99, %103, %cst_51 {dimension_numbers = #tpu.dot_dimension_numbers<[1], [0], [0], [1], [0, 0, 1, 1], [], []>} : vector<8x32xbf16>, vector<32x32xbf16>, vector<8x32xf32> -> vector<8x32xf32>
      %c0_52 = arith.constant 0 : index
      %c0_53 = arith.constant 0 : index
      %105 = vector.load %arg8[%c0_52, %c0_53] : memref<1x32xf32, #tpu.memory_space<vmem>>, vector<1x32xf32>
      %106 = vector.broadcast %105 : vector<1x32xf32> to vector<8x32xf32>
      %107 = arith.addf %104, %106 : vector<8x32xf32>
      %c0_54 = arith.constant 0 : index
      %c0_55 = arith.constant 0 : index
      %108 = vector.load %arg9[%c0_54, %c0_55] : memref<32x32xbf16, #tpu.memory_space<vmem>>, vector<32x32xbf16>
      %cst_56 = arith.constant dense<0.000000e+00> : vector<8x32xf32>
      %109 = tpu.matmul %102, %108, %cst_56 {dimension_numbers = #tpu.dot_dimension_numbers<[1], [0], [0], [1], [0, 0, 1, 1], [], []>} : vector<8x32xbf16>, vector<32x32xbf16>, vector<8x32xf32> -> vector<8x32xf32>
      %c0_57 = arith.constant 0 : index
      %c0_58 = arith.constant 0 : index
      %110 = vector.load %arg10[%c0_57, %c0_58] : memref<1x32xf32, #tpu.memory_space<vmem>>, vector<1x32xf32>
      %111 = vector.broadcast %110 : vector<1x32xf32> to vector<8x32xf32>
      %112 = arith.addf %109, %111 : vector<8x32xf32>
      %113 = arith.truncf %107 : vector<8x32xf32> to vector<8x32xbf16>
      %c0_59 = arith.constant 0 : index
      %c0_60 = arith.constant 0 : index
      %114 = vector.load %arg14[%c0_59, %c0_60] : memref<8x32xbf16, #tpu.memory_space<vmem>>, vector<8x32xbf16>
      tpu.vector_store %arg14[%c0_59, %c0_60], %113 {strides = array<i32>} : memref<8x32xbf16, #tpu.memory_space<vmem>>, vector<8x32xbf16>,
      %115 = arith.truncf %112 : vector<8x32xf32> to vector<8x32xbf16>
      %c0_61 = arith.constant 0 : index
      %c0_62 = arith.constant 0 : index
      %116 = vector.load %arg15[%c0_61, %c0_62] : memref<8x32xbf16, #tpu.memory_space<vmem>>, vector<8x32xbf16>
      tpu.vector_store %arg15[%c0_61, %c0_62], %115 {strides = array<i32>} : memref<8x32xbf16, #tpu.memory_space<vmem>>, vector<8x32xbf16>,
    } else {
    }
    %c0 = arith.constant 0 : index
    %c0_1 = arith.constant 0 : index
    %c0_2 = arith.constant 0 : index
    %3 = vector.load %arg2[%c0, %c0_1, %c0_2] : memref<1x8x32xf32, #tpu.memory_space<vmem>>, vector<1x8x32xf32>
    %4 = vector.shape_cast %3 : vector<1x8x32xf32> to vector<8x32xf32>
    %5 = arith.truncf %4 : vector<8x32xf32> to vector<8x32xbf16>
    %c0_3 = arith.constant 0 : index
    %c0_4 = arith.constant 0 : index
    %6 = vector.load %arg5[%c0_3, %c0_4] : memref<32x32xbf16, #tpu.memory_space<vmem>>, vector<32x32xbf16>
    %cst = arith.constant dense<0.000000e+00> : vector<8x32xf32>
    %7 = tpu.matmul %5, %6, %cst {dimension_numbers = #tpu.dot_dimension_numbers<[1], [0], [0], [1], [0, 0, 1, 1], [], []>} : vector<8x32xbf16>, vector<32x32xbf16>, vector<8x32xf32> -> vector<8x32xf32>
    %c0_5 = arith.constant 0 : index
    %c0_6 = arith.constant 0 : index
    %8 = vector.load %arg6[%c0_5, %c0_6] : memref<1x32xf32, #tpu.memory_space<vmem>>, vector<1x32xf32>
    %9 = vector.broadcast %8 : vector<1x32xf32> to vector<8x32xf32>
    %10 = arith.addf %7, %9 : vector<8x32xf32>
    %cst_7 = arith.constant 0.353553385 : f32
    %11 = vector.broadcast %cst_7 : f32 to vector<8x32xf32>
    %12 = arith.mulf %10, %11 : vector<8x32xf32>
    %13 = arith.truncf %12 : vector<8x32xf32> to vector<8x32xbf16>
    %c0_8 = arith.constant 0 : index
    %c0_9 = arith.constant 0 : index
    %14 = vector.load %arg14[%c0_8, %c0_9] : memref<8x32xbf16, #tpu.memory_space<vmem>>, vector<8x32xbf16>
    %c0_10 = arith.constant 0 : index
    %c0_11 = arith.constant 0 : index
    %15 = vector.load %arg15[%c0_10, %c0_11] : memref<8x32xbf16, #tpu.memory_space<vmem>>, vector<8x32xbf16>
    %16 = vector.extract_strided_slice %13 {offsets = [0, 0], sizes = [8, 8], strides = [1, 1]} : vector<8x32xbf16> to vector<8x8xbf16>
    %17 = vector.extract_strided_slice %14 {offsets = [0, 0], sizes = [8, 8], strides = [1, 1]} : vector<8x32xbf16> to vector<8x8xbf16>
    %18 = vector.extract_strided_slice %15 {offsets = [0, 0], sizes = [8, 8], strides = [1, 1]} : vector<8x32xbf16> to vector<8x8xbf16>
    %cst_12 = arith.constant dense<0.000000e+00> : vector<8x8xf32>
    %19 = tpu.matmul %16, %17, %cst_12 {dimension_numbers = #tpu.dot_dimension_numbers<[1], [1], [0], [0], [0, 0, 1, 0], [], []>} : vector<8x8xbf16>, vector<8x8xbf16>, vector<8x8xf32> -> vector<8x8xf32>
    %cst_13 = arith.constant dense<0xFF800000> : vector<8xf32>
    %20 = vector.multi_reduction <maximumf>, %19, %cst_13 [1] : vector<8x8xf32> to vector<8xf32>
    %21 = vector.shape_cast %20 : vector<8xf32> to vector<8x1xf32>
    %22 = vector.broadcast %21 : vector<8x1xf32> to vector<8x8xf32>
    %23 = arith.subf %19, %22 : vector<8x8xf32>
    %24 = math.exp %23 : vector<8x8xf32>
    %cst_14 = arith.constant dense<0.000000e+00> : vector<8xf32>
    %25 = vector.multi_reduction <add>, %24, %cst_14 [1] : vector<8x8xf32> to vector<8xf32>
    %26 = vector.shape_cast %25 : vector<8xf32> to vector<8x1xf32>
    %27 = arith.truncf %24 : vector<8x8xf32> to vector<8x8xbf16>
    %cst_15 = arith.constant dense<0.000000e+00> : vector<8x8xf32>
    %28 = tpu.matmul %27, %18, %cst_15 {dimension_numbers = #tpu.dot_dimension_numbers<[1], [0], [0], [1], [0, 0, 1, 1], [], []>} : vector<8x8xbf16>, vector<8x8xbf16>, vector<8x8xf32> -> vector<8x8xf32>
    %29 = tpu.reciprocal %26 {approx = true} : vector<8x1xf32> -> vector<8x1xf32>
    %30 = vector.broadcast %29 : vector<8x1xf32> to vector<8x8xf32>
    %31 = arith.mulf %28, %30 : vector<8x8xf32>
    %32 = arith.truncf %31 : vector<8x8xf32> to vector<8x8xbf16>
    %c0_16 = arith.constant 0 : index
    %c0_17 = arith.constant 0 : index
    %33 = vector.load %arg16[%c0_16, %c0_17] : memref<8x32xbf16, #tpu.memory_space<vmem>>, vector<8x8xbf16>
    tpu.vector_store %arg16[%c0_16, %c0_17], %32 {strides = array<i32>} : memref<8x32xbf16, #tpu.memory_space<vmem>>, vector<8x8xbf16>,
    %34 = vector.extract_strided_slice %13 {offsets = [0, 8], sizes = [8, 8], strides = [1, 1]} : vector<8x32xbf16> to vector<8x8xbf16>
    %35 = vector.extract_strided_slice %14 {offsets = [0, 8], sizes = [8, 8], strides = [1, 1]} : vector<8x32xbf16> to vector<8x8xbf16>
    %36 = vector.extract_strided_slice %15 {offsets = [0, 8], sizes = [8, 8], strides = [1, 1]} : vector<8x32xbf16> to vector<8x8xbf16>
    %cst_18 = arith.constant dense<0.000000e+00> : vector<8x8xf32>
    %37 = tpu.matmul %34, %35, %cst_18 {dimension_numbers = #tpu.dot_dimension_numbers<[1], [1], [0], [0], [0, 0, 1, 0], [], []>} : vector<8x8xbf16>, vector<8x8xbf16>, vector<8x8xf32> -> vector<8x8xf32>
    %cst_19 = arith.constant dense<0xFF800000> : vector<8xf32>
    %38 = vector.multi_reduction <maximumf>, %37, %cst_19 [1] : vector<8x8xf32> to vector<8xf32>
    %39 = vector.shape_cast %38 : vector<8xf32> to vector<8x1xf32>
    %40 = vector.broadcast %39 : vector<8x1xf32> to vector<8x8xf32>
    %41 = arith.subf %37, %40 : vector<8x8xf32>
    %42 = math.exp %41 : vector<8x8xf32>
    %cst_20 = arith.constant dense<0.000000e+00> : vector<8xf32>
    %43 = vector.multi_reduction <add>, %42, %cst_20 [1] : vector<8x8xf32> to vector<8xf32>
    %44 = vector.shape_cast %43 : vector<8xf32> to vector<8x1xf32>
    %45 = arith.truncf %42 : vector<8x8xf32> to vector<8x8xbf16>
    %cst_21 = arith.constant dense<0.000000e+00> : vector<8x8xf32>
    %46 = tpu.matmul %45, %36, %cst_21 {dimension_numbers = #tpu.dot_dimension_numbers<[1], [0], [0], [1], [0, 0, 1, 1], [], []>} : vector<8x8xbf16>, vector<8x8xbf16>, vector<8x8xf32> -> vector<8x8xf32>
    %47 = tpu.reciprocal %44 {approx = true} : vector<8x1xf32> -> vector<8x1xf32>
    %48 = vector.broadcast %47 : vector<8x1xf32> to vector<8x8xf32>
    %49 = arith.mulf %46, %48 : vector<8x8xf32>
    %50 = arith.truncf %49 : vector<8x8xf32> to vector<8x8xbf16>
    %c0_22 = arith.constant 0 : index
    %c8 = arith.constant 8 : index
    %51 = vector.load %arg16[%c0_22, %c8] : memref<8x32xbf16, #tpu.memory_space<vmem>>, vector<8x8xbf16>
    tpu.vector_store %arg16[%c0_22, %c8], %50 {strides = array<i32>} : memref<8x32xbf16, #tpu.memory_space<vmem>>, vector<8x8xbf16>,
    %52 = vector.extract_strided_slice %13 {offsets = [0, 16], sizes = [8, 8], strides = [1, 1]} : vector<8x32xbf16> to vector<8x8xbf16>
    %53 = vector.extract_strided_slice %14 {offsets = [0, 16], sizes = [8, 8], strides = [1, 1]} : vector<8x32xbf16> to vector<8x8xbf16>
    %54 = vector.extract_strided_slice %15 {offsets = [0, 16], sizes = [8, 8], strides = [1, 1]} : vector<8x32xbf16> to vector<8x8xbf16>
    %cst_23 = arith.constant dense<0.000000e+00> : vector<8x8xf32>
    %55 = tpu.matmul %52, %53, %cst_23 {dimension_numbers = #tpu.dot_dimension_numbers<[1], [1], [0], [0], [0, 0, 1, 0], [], []>} : vector<8x8xbf16>, vector<8x8xbf16>, vector<8x8xf32> -> vector<8x8xf32>
    %cst_24 = arith.constant dense<0xFF800000> : vector<8xf32>
    %56 = vector.multi_reduction <maximumf>, %55, %cst_24 [1] : vector<8x8xf32> to vector<8xf32>
    %57 = vector.shape_cast %56 : vector<8xf32> to vector<8x1xf32>
    %58 = vector.broadcast %57 : vector<8x1xf32> to vector<8x8xf32>
    %59 = arith.subf %55, %58 : vector<8x8xf32>
    %60 = math.exp %59 : vector<8x8xf32>
    %cst_25 = arith.constant dense<0.000000e+00> : vector<8xf32>
    %61 = vector.multi_reduction <add>, %60, %cst_25 [1] : vector<8x8xf32> to vector<8xf32>
    %62 = vector.shape_cast %61 : vector<8xf32> to vector<8x1xf32>
    %63 = arith.truncf %60 : vector<8x8xf32> to vector<8x8xbf16>
    %cst_26 = arith.constant dense<0.000000e+00> : vector<8x8xf32>
    %64 = tpu.matmul %63, %54, %cst_26 {dimension_numbers = #tpu.dot_dimension_numbers<[1], [0], [0], [1], [0, 0, 1, 1], [], []>} : vector<8x8xbf16>, vector<8x8xbf16>, vector<8x8xf32> -> vector<8x8xf32>
    %65 = tpu.reciprocal %62 {approx = true} : vector<8x1xf32> -> vector<8x1xf32>
    %66 = vector.broadcast %65 : vector<8x1xf32> to vector<8x8xf32>
    %67 = arith.mulf %64, %66 : vector<8x8xf32>
    %68 = arith.truncf %67 : vector<8x8xf32> to vector<8x8xbf16>
    %c0_27 = arith.constant 0 : index
    %c16 = arith.constant 16 : index
    %69 = vector.load %arg16[%c0_27, %c16] : memref<8x32xbf16, #tpu.memory_space<vmem>>, vector<8x8xbf16>
    tpu.vector_store %arg16[%c0_27, %c16], %68 {strides = array<i32>} : memref<8x32xbf16, #tpu.memory_space<vmem>>, vector<8x8xbf16>,
    %70 = vector.extract_strided_slice %13 {offsets = [0, 24], sizes = [8, 8], strides = [1, 1]} : vector<8x32xbf16> to vector<8x8xbf16>
    %71 = vector.extract_strided_slice %14 {offsets = [0, 24], sizes = [8, 8], strides = [1, 1]} : vector<8x32xbf16> to vector<8x8xbf16>
    %72 = vector.extract_strided_slice %15 {offsets = [0, 24], sizes = [8, 8], strides = [1, 1]} : vector<8x32xbf16> to vector<8x8xbf16>
    %cst_28 = arith.constant dense<0.000000e+00> : vector<8x8xf32>
    %73 = tpu.matmul %70, %71, %cst_28 {dimension_numbers = #tpu.dot_dimension_numbers<[1], [1], [0], [0], [0, 0, 1, 0], [], []>} : vector<8x8xbf16>, vector<8x8xbf16>, vector<8x8xf32> -> vector<8x8xf32>
    %cst_29 = arith.constant dense<0xFF800000> : vector<8xf32>
    %74 = vector.multi_reduction <maximumf>, %73, %cst_29 [1] : vector<8x8xf32> to vector<8xf32>
    %75 = vector.shape_cast %74 : vector<8xf32> to vector<8x1xf32>
    %76 = vector.broadcast %75 : vector<8x1xf32> to vector<8x8xf32>
    %77 = arith.subf %73, %76 : vector<8x8xf32>
    %78 = math.exp %77 : vector<8x8xf32>
    %cst_30 = arith.constant dense<0.000000e+00> : vector<8xf32>
    %79 = vector.multi_reduction <add>, %78, %cst_30 [1] : vector<8x8xf32> to vector<8xf32>
    %80 = vector.shape_cast %79 : vector<8xf32> to vector<8x1xf32>
    %81 = arith.truncf %78 : vector<8x8xf32> to vector<8x8xbf16>
    %cst_31 = arith.constant dense<0.000000e+00> : vector<8x8xf32>
    %82 = tpu.matmul %81, %72, %cst_31 {dimension_numbers = #tpu.dot_dimension_numbers<[1], [0], [0], [1], [0, 0, 1, 1], [], []>} : vector<8x8xbf16>, vector<8x8xbf16>, vector<8x8xf32> -> vector<8x8xf32>
    %83 = tpu.reciprocal %80 {approx = true} : vector<8x1xf32> -> vector<8x1xf32>
    %84 = vector.broadcast %83 : vector<8x1xf32> to vector<8x8xf32>
    %85 = arith.mulf %82, %84 : vector<8x8xf32>
    %86 = arith.truncf %85 : vector<8x8xf32> to vector<8x8xbf16>
    %c0_32 = arith.constant 0 : index
    %c24 = arith.constant 24 : index
    %87 = vector.load %arg16[%c0_32, %c24] : memref<8x32xbf16, #tpu.memory_space<vmem>>, vector<8x8xbf16>
    tpu.vector_store %arg16[%c0_32, %c24], %86 {strides = array<i32>} : memref<8x32xbf16, #tpu.memory_space<vmem>>, vector<8x8xbf16>,
    %c0_33 = arith.constant 0 : index
    %c0_34 = arith.constant 0 : index
    %88 = vector.load %arg16[%c0_33, %c0_34] : memref<8x32xbf16, #tpu.memory_space<vmem>>, vector<8x32xbf16>
    %c0_35 = arith.constant 0 : index
    %c0_36 = arith.constant 0 : index
    %89 = vector.load %arg11[%c0_35, %c0_36] : memref<32x32xbf16, #tpu.memory_space<vmem>>, vector<32x32xbf16>
    %cst_37 = arith.constant dense<0.000000e+00> : vector<8x32xf32>
    %90 = tpu.matmul %88, %89, %cst_37 {dimension_numbers = #tpu.dot_dimension_numbers<[1], [0], [0], [1], [0, 0, 1, 1], [], []>} : vector<8x32xbf16>, vector<32x32xbf16>, vector<8x32xf32> -> vector<8x32xf32>
    %c0_38 = arith.constant 0 : index
    %c0_39 = arith.constant 0 : index
    %91 = vector.load %arg12[%c0_38, %c0_39] : memref<1x32xf32, #tpu.memory_space<vmem>>, vector<1x32xf32>
    %92 = vector.broadcast %91 : vector<1x32xf32> to vector<8x32xf32>
    %93 = arith.addf %90, %92 : vector<8x32xf32>
    %c0_40 = arith.constant 0 : index
    %c0_41 = arith.constant 0 : index
    %c0_42 = arith.constant 0 : index
    %94 = vector.load %arg13[%c0_40, %c0_41, %c0_42] : memref<1x8x32xf32, #tpu.memory_space<vmem>>, vector<1x8x32xf32>
    %95 = vector.shape_cast %94 : vector<1x8x32xf32> to vector<8x32xf32>
    %96 = vector.shape_cast %93 : vector<8x32xf32> to vector<1x8x32xf32>
    tpu.vector_store %arg13[%c0_40, %c0_41, %c0_42], %96 {strides = array<i32>} : memref<1x8x32xf32, #tpu.memory_space<vmem>>, vector<1x8x32xf32>,
    return
  }
  func.func @transform_0(%arg0: i32, %arg1: i32) -> (i32, i32, i32) {
    %c0_i32 = arith.constant 0 : i32
    %c0_i32_0 = arith.constant 0 : i32
    return %arg0, %arg1, %c0_i32 : i32, i32, i32
  }
  func.func @transform_1(%arg0: i32, %arg1: i32) -> (i32, i32, i32) {
    %c0_i32 = arith.constant 0 : i32
    %c0_i32_0 = arith.constant 0 : i32
    %c0_i32_1 = arith.constant 0 : i32
    return %arg0, %c0_i32, %c0_i32_0 : i32, i32, i32
  }
  func.func @transform_2(%arg0: i32, %arg1: i32) -> (i32, i32, i32) {
    %c0_i32 = arith.constant 0 : i32
    %c0_i32_0 = arith.constant 0 : i32
    %c0_i32_1 = arith.constant 0 : i32
    return %arg0, %c0_i32, %c0_i32_0 : i32, i32, i32
  }
  func.func @transform_3(%arg0: i32, %arg1: i32) -> (i32, i32) {
    %c0_i32 = arith.constant 0 : i32
    %c0_i32_0 = arith.constant 0 : i32
    %c0_i32_1 = arith.constant 0 : i32
    return %c0_i32, %c0_i32_0 : i32, i32
  }
  func.func @transform_4(%arg0: i32, %arg1: i32) -> (i32, i32) {
    %c0_i32 = arith.constant 0 : i32
    %c0_i32_0 = arith.constant 0 : i32
    %c0_i32_1 = arith.constant 0 : i32
    return %c0_i32, %c0_i32_0 : i32, i32
  }
  func.func @transform_5(%arg0: i32, %arg1: i32) -> (i32, i32) {
    %c0_i32 = arith.constant 0 : i32
    %c0_i32_0 = arith.constant 0 : i32
    %c0_i32_1 = arith.constant 0 : i32
    return %c0_i32, %c0_i32_0 : i32, i32
  }
  func.func @transform_6(%arg0: i32, %arg1: i32) -> (i32, i32) {
    %c0_i32 = arith.constant 0 : i32
    %c0_i32_0 = arith.constant 0 : i32
    %c0_i32_1 = arith.constant 0 : i32
    return %c0_i32, %c0_i32_0 : i32, i32
  }
  func.func @transform_7(%arg0: i32, %arg1: i32) -> (i32, i32) {
    %c0_i32 = arith.constant 0 : i32
    %c0_i32_0 = arith.constant 0 : i32
    %c0_i32_1 = arith.constant 0 : i32
    return %c0_i32, %c0_i32_0 : i32, i32
  }
  func.func @transform_8(%arg0: i32, %arg1: i32) -> (i32, i32) {
    %c0_i32 = arith.constant 0 : i32
    %c0_i32_0 = arith.constant 0 : i32
    %c0_i32_1 = arith.constant 0 : i32
    return %c0_i32, %c0_i32_0 : i32, i32
  }
  func.func @transform_9(%arg0: i32, %arg1: i32) -> (i32, i32) {
    %c0_i32 = arith.constant 0 : i32
    %c0_i32_0 = arith.constant 0 : i32
    %c0_i32_1 = arith.constant 0 : i32
    return %c0_i32, %c0_i32_0 : i32, i32
  }
  func.func @transform_10(%arg0: i32, %arg1: i32) -> (i32, i32) {
    %c0_i32 = arith.constant 0 : i32
    %c0_i32_0 = arith.constant 0 : i32
    %c0_i32_1 = arith.constant 0 : i32
    return %c0_i32, %c0_i32_0 : i32, i32
  }
  func.func @transform_11(%arg0: i32, %arg1: i32) -> (i32, i32, i32) {
    %c0_i32 = arith.constant 0 : i32
    %c0_i32_0 = arith.constant 0 : i32
    return %arg0, %arg1, %c0_i32 : i32, i32, i32
  }
}

</mosaic_0001>

<bundles_post_ra>
// kernel: tpu_custom_call.1
= control target key start
LH: loop header
LB: loop body
LE: loop exit
PB: predicated region body
PF: predicated region fallthrough
CT: control target
= control target key end

     0   :  { %s2553_s0 = inlined_call_operand.hbm [shape: f32[2,8,32], index: 0, kind: input, shape index: {}]   ;;  %s2554_s1 = inlined_call_operand.hbm [shape: f32[2,8,32], index: 1, kind: input, shape index: {}]   ;;  %s2555_s2 = inlined_call_operand.hbm [shape: f32[2,8,32], index: 2, kind: input, shape index: {}]   ;;  %s2556_s3 = inlined_call_operand.hbm [shape: bf16[32,32], index: 3, kind: input, shape index: {}]   ;;  %s2557_s4 = inlined_call_operand.vmem [shape: f32[1,32], index: 4, kind: input, shape index: {}]   ;;  %s2558_s5 = inlined_call_operand.vmem [shape: bf16[32,32], index: 5, kind: input, shape index: {}]   ;;  %s2559_s6 = inlined_call_operand.vmem [shape: f32[1,32], index: 6, kind: input, shape index: {}]   ;;  %s2560_s7 = inlined_call_operand.hbm [shape: bf16[32,32], index: 7, kind: input, shape index: {}]   ;;  %s2561_s8 = inlined_call_operand.hbm [shape: f32[1,32], index: 8, kind: input, shape index: {}]   ;;  %s2562_s9 = inlined_call_operand.vmem [shape: bf16[32,32], index: 9, kind: input, shape index: {}]   ;;  %s2563_s10 = inlined_call_operand.vmem [shape: f32[1,32], index: 10, kind: input, shape index: {}]   ;;  %s2564_s11 = inlined_call_operand.hbm [shape: f32[2,8,32], index: 11, kind: output, shape index: {}]  }
   0x1   :  { %2590 = sst [smem:[#allocation30_spill]] %s2554_s1 }
   0x2   :  { %2591 = sst [smem:[#allocation31_spill]] %s2556_s3 }
   0x3   :  { %2592 = sst [smem:[#allocation32_spill]] %s2557_s4 }
   0x4   :  { %2593 = sst [smem:[#allocation33_spill]] %s2559_s6 }
   0x5   :  { %2594 = sst [smem:[#allocation34_spill]] %s2562_s9 }
   0x6   :  { %2595 = sst [smem:[#allocation35_spill]] %s2563_s10 }
   0x7   :  { %2596 = sst [smem:[#allocation36_spill]] %s2564_s11 }
   0x8   :  { %16 = vsyncpa [#allocation6], 0 }
   0x9   :  { %18 = vsyncpa [#allocation6 + $0x1], 0 }
   0xa   :  { %19 = vsyncpa [#allocation9], 0 }
   0xb   :  { %21 = vsyncpa [#allocation9 + $0x1], 0 }
   0xc   :  { %22 = vsyncpa [#allocation12], 0 }
   0xd   :  { %23 = vsyncpa [#allocation15], 0 }
   0xe   :  { %24 = vsyncpa [#allocation7], 0 }
   0xf   :  { %26 = vsyncpa [#allocation7 + $0x1], 0  ;;  %s2111_s17 = smov 0   ;;  %s2113_s18 = smov 0  }
  0x10   :  { %s2115_s19 = smov 0   ;;  %s2117_s20 = smov 0  }
  0x11   :  { %s2119_s21 = smov 0   ;;  %s2121_s22 = smov 0  }
  0x12 LB: > { %2597 = sst [smem:[#allocation22_spill]] %s2012_s17  ;;  %s2142_s23 = sadd.s32 4294967295, %s2032_s22   ;;  %s2032_s22 = sphi %s2121_s22, %s32_s22   ;;  %s2028_s21 = sphi %s2119_s21, %s2646_s21   ;;  %s2024_s20 = sphi %s2117_s20, %s2645_s20   ;;  %s2020_s19 = sphi %s2115_s19, %s2649_s19   ;;  %s2016_s18 = sphi %s2113_s18, %s2648_s18   ;;  %s2012_s17 = sphi %s2111_s17, %s2647_s17  }
  0x13   : > { %2598 = sst [smem:[#allocation23_spill]] %s2024_s20  ;;  %s1461_s24 = sadd.s32 4294967294, %s2032_s22  }
  0x14   : > { %2599 = sst [smem:[#allocation24_spill]] %s2028_s21  ;;  %p66_p0 = scmp.ne.s32.totalorder %s2016_s18, %s2012_s17 }
  0x15   : > { %2600 = sst [smem:[#allocation25_spill]] %s2032_s22  ;;  %p2567_p1 = scmp.eq.s32.totalorder %s2142_s23, 0 }
  0x16   : > { %p318_p3 = scmp.eq.s32.totalorder %s1461_s24, 1  ;;  %p1462_p5 = scmp.ge.s32.totalorder %s2032_s22, 1 }
  0x17   : > { %p2151_p4 = por %p2567_p1, %p66_p0  ;;  %p325_p7 = scmp.lt.s32.totalorder %s2032_s22, 3 }
  0x18   : > { %p2156_p6 = por %p318_p3, %p66_p0  ;;  %s2034_s28 = smov [#allocation11]  }
  0x19   : > { %s2601_s25 = scalar_select %p2151_p4, 1, 0 }
  0x1a   : > { %s2602_s26 = scalar_select %p2156_p6, 1, 0 }
  0x1b   : > { %p2161_p8 = pnand %p1462_p5, %p325_p7  ;;  %s337_s29 = sshll.u32 %s2034_s28, 4  ;;  %s338_s29 = int_to_ptr.vmem [resolvable:$true] %s337_s29 }
  0x1c   : > { %2603 = sst [smem:[#allocation26_spill]] %s2602_s26  ;;  %s44_s12 = sadd.s32 1, %s2028_s21 }
  0x1d   : > { %s2604_s27 = scalar_select %p2161_p8, 1, 0 }
  0x1e   : > { %p1645_p9 = pneg %p2161_p8  ;;  %s2606_s3 = sld [smem:[#allocation31_spill]] }
  0x20   : > { %p2170_p11 = pnand %p1645_p9, %p2567_p1 }
  0x22   : > { %s2605_s30 = scalar_select %p2170_p11, 1, 0 }
  0x23   : > { %p2183_p13 = pneg %p2170_p11 }
  0x24   : > { %s1764_s15 = scalar_lea.hbm %s2606_s3, 256 }
  0x25   : > { %p1765_p12 = scmp.ne.s32.totalorder %s2606_s3, %s1764_s15  ;;  %p1771_p5 = scmp.lt.u32.totalorder %s1764_s15, %s2606_s3 }
  0x26   : > { %s2607_s28 = scalar_select %p2183_p13, 1, 0 }
  0x27   : > { %p1767_p0 = pnand %p2183_p13, %p1765_p12 }
  0x29   : > { %p1768_p3 = pneg %p1767_p0 }
  0x2b   : > { %p1773_p7 = pnand %p1771_p5, %p1768_p3 }
  0x2d   : > { %1776 = shalt.err (!%p1773_p7)
}
  0x2e   : > { %s1777_s13 = scalar_lea.vmem %s338_s29, 256  ;;  %p1785_p2 = scmp.lt.s32.totalorder %s338_s29, %s338_s29 }
  0x2f   : > { %p1778_p9 = scmp.ne.s32.totalorder %s338_s29, %s1777_s13  ;;  %p1786_p6 = scmp.lt.s32.totalorder %s1777_s13, %s1777_s13 }
  0x31   : > { %p1780_p10 = pnand %p1778_p9, %p2183_p13  ;;  %p1787_p4 = por %p1786_p6, %p1785_p2 }
  0x33   : > { %p1781_p1 = pneg %p1780_p10 }
  0x35   : > { %p1788_p8 = pnand %p1787_p4, %p1781_p1 }
  0x37   : > { %1791 = shalt.err (!%p1788_p8)
}
  0x38   : > { %s2571_s14 = smov 64   ;;  %s2572_s17 = smov 4  }
  0x39   : > { %1648 = dma.hbm_to_vmem [thread:$0]  (!%p2170_p11), %s2606_s3, 256, %s338_s29, [#allocation12], %s2571_s14, %s2571_s14, %s2572_s17  }
  0x3a   : > { %p46_p1 = scmp.ge.s32.totalorder %s44_s12, 2  ;;  %s53_s16 = sadd.s32 1, %s2020_s19 }
  0x3b   : > { %p60_p2 = scmp.ne.s32.totalorder %s2020_s19, %s2016_s18  ;;  %p61_p4 = scmp.eq.s32.totalorder %s2032_s22, 0 }
  0x3c   : > { %s2651_s12 = smov (%p46_p1, %s44_s12), 0  ;;  %p2609_p8 = scmp.eq.s32.totalorder %s2142_s23, 1 }
  0x3d   : > { %2608 = sst [smem:[#allocation27_spill]] %s2651_s12  ;;  %p62_p6 = por %p61_p4, %p60_p2 }
  0x3e   : > { %p2210_p10 = por %p2609_p8, %p60_p2  ;;  %s48_s13 = ssub.s32 %s2028_s21, %s2651_s12 }
  0x3f   : > { %p1672_p12 = scmp.lt.s32.totalorder %s2032_s22, 2  ;;  %p51_p0 = scmp.eq.s32.totalorder %s48_s13, 0 }
  0x40   : > { %s2610_s24 = scalar_select %p2210_p10, 1, 0 }
  0x41   : > { %s2574_s11 = sand.u32 1, %s2020_s19   ;;  %s2223_s26 = sshll.u32 %s2028_s21, 7 }
  0x42   : > { %2611 = sst [smem:[#allocation28_spill]] %s2610_s24  ;;  %s2220_s29 = sshll.u32 %s2574_s11, 3 }
  0x43   : > { %s2226_s15 = scalar_select %p51_p0, %s2020_s19, %s53_s16  }
  0x44   : > { %p2228_p3 = pnand %p1672_p12, %p62_p6  ;;  %s409_s17 = sand.u32 1, %s2032_s22  }
  0x45   : > { %2612 = sst [smem:[#allocation29_spill]] %s2226_s15  ;;  %s2614_s1 = sld [smem:[#allocation30_spill]] }
  0x46   : > { %s2613_s14 = scalar_select %p2228_p3, 1, 0 }
  0x47   : > { %s413_s11 = scalar_lea.vmem [#allocation8], %s2220_s29  ;;  %s2037_s16 = smov [#allocation13]  }
  0x48   : > { %s420_s21 = sshll.u32 %s413_s11, 4  ;;  %s2242_s15 = sshll.u32 %s2037_s16, 4  ;;  %s2240_s21 = int_to_ptr.vmem [resolvable:$true] %s420_s21  ;;  %s360_s15 = int_to_ptr.vmem [resolvable:$true] %s2242_s15 }
  0x49   : > { %s2244_s24 = scalar_lea.sflag [#allocation9], %s409_s17  ;;  %p2250_p7 = pneg %p2228_p3 }
  0x4b   : > { %s2237_s13 = scalar_lea.hbm %s2614_s1, %s2223_s26  ;;  %s1797_s22 = scalar_lea.hbm %s2614_s1, 256 }
  0x4c   : > { %s1792_s10 = scalar_lea.hbm %s2237_s13, 128  ;;  %p1798_p2 = scmp.lt.u32.totalorder %s2237_s13, %s2614_s1 }
  0x4d   : > { %p1793_p5 = scmp.ne.s32.totalorder %s2237_s13, %s1792_s10  ;;  %p1799_p4 = scmp.lt.u32.totalorder %s1797_s22, %s1792_s10 }
  0x4e   : > { %s2615_s3 = scalar_select %p2250_p7, 1, 0 }
  0x4f   : > { %p1795_p9 = pnand %p2250_p7, %p1793_p5  ;;  %p1800_p6 = por %p1799_p4, %p1798_p2 }
  0x50   : > { %p1801_p8 = scmp.lt.u32.totalorder %s1792_s10, %s2237_s13 }
  0x51   : > { %p1796_p1 = pneg %p1795_p9 }
  0x52   : > { %p1802_p12 = por %p1801_p8, %p1800_p6 }
  0x54   : > { %p1803_p0 = pnand %p1802_p12, %p1796_p1 }
  0x56   : > { %1806 = shalt.err (!%p1803_p0)
}
  0x57   : > { %s1807_s17 = scalar_lea.vmem %s2240_s21, 128  ;;  %s2038_s12 = smov [#allocation8]  }
  0x58   : > { %p1808_p5 = scmp.ne.s32.totalorder %s2240_s21, %s1807_s17  ;;  %s1812_s11 = sshll.u32 %s2038_s12, 4  ;;  %s1813_s11 = int_to_ptr.vmem [resolvable:$false] %s1812_s11 }
  0x59   : > { %s1814_s20 = scalar_lea.vmem %s1813_s11, 256  ;;  %p1815_p11 = scmp.lt.s32.totalorder %s2240_s21, %s1813_s11 }
  0x5a   : > { %p1810_p9 = pnand %p1808_p5, %p2250_p7  ;;  %p1816_p13 = scmp.lt.s32.totalorder %s1814_s20, %s1807_s17 }
  0x5c   : > { %p1811_p10 = pneg %p1810_p9  ;;  %p1817_p2 = por %p1816_p13, %p1815_p11 }
  0x5e   : > { %p1818_p4 = pnand %p1817_p2, %p1811_p10 }
  0x60   : > { %1821 = shalt.err (!%p1818_p4)
}
  0x61   : > { %1661 = dma.hbm_to_vmem [thread:$0]  (!%p2228_p3), %s2237_s13, 128, %s2240_s21, %s2244_s24  }
  0x62   : > { %s1822_s16 = scalar_lea.hbm %s2560_s7, 256  ;;  %p2616_p11 = scmp.ne.s32.totalorder %s2607_s28, 0 }
  0x63   : > { %p1823_p1 = scmp.ne.s32.totalorder %s2560_s7, %s1822_s16  ;;  %p1829_p6 = scmp.lt.u32.totalorder %s1822_s16, %s2560_s7 }
  0x65   : > { %p1825_p13 = pnand %p1823_p1, %p2616_p11 }
  0x67   : > { %p1826_p10 = pneg %p1825_p13 }
  0x69   : > { %p1831_p8 = pnand %p1829_p6, %p1826_p10 }
  0x6b   : > { %1834 = shalt.err (!%p1831_p8)
}
  0x6c   : > { %s1835_s20 = scalar_lea.vmem %s360_s15, 256  ;;  %p1843_p9 = scmp.lt.s32.totalorder %s360_s15, %s360_s15 }
  0x6d   : > { %p1836_p12 = scmp.ne.s32.totalorder %s360_s15, %s1835_s20  ;;  %p1844_p2 = scmp.lt.s32.totalorder %s1835_s20, %s1835_s20 }
  0x6f   : > { %p1838_p0 = pnand %p1836_p12, %p2616_p11  ;;  %p1845_p4 = por %p1844_p2, %p1843_p9 }
  0x71   : > { %p1839_p5 = pneg %p1838_p0 }
  0x73   : > { %p1846_p3 = pnand %p1845_p4, %p1839_p5 }
  0x75   : > { %1849 = shalt.err (!%p1846_p3)
}
  0x76   : > { %p2617_p1 = scmp.ne.s32.totalorder %s2605_s30, 0  ;;  %s2618_s1 = smov 4  }
  0x77   : > { %s2619_s21 = smov 64   ;;  %s2039_s22 = smov [#allocation14]  }
  0x78   : > { %1651 = dma.hbm_to_vmem [thread:$0]  (!%p2617_p1), %s2560_s7, 256, %s360_s15, [#allocation12], %s2619_s21, %s2619_s21, %s2618_s1  }
  0x79   : > { %s373_s16 = sshll.u32 %s2039_s22, 4  ;;  %s1850_s11 = scalar_lea.hbm %s2561_s8, 16  ;;  %s374_s16 = int_to_ptr.vmem [resolvable:$true] %s373_s16 }
  0x7a   : > { %p1851_p3 = scmp.ne.s32.totalorder %s2561_s8, %s1850_s11  ;;  %p1857_p6 = scmp.lt.u32.totalorder %s1850_s11, %s2561_s8 }
  0x7c   : > { %p1853_p13 = pnand %p1851_p3, %p2616_p11 }
  0x7e   : > { %p1854_p10 = pneg %p1853_p13 }
  0x80   : > { %p1859_p8 = pnand %p1857_p6, %p1854_p10 }
  0x82   : > { %1862 = shalt.err (!%p1859_p8)
}
  0x83   : > { %s1863_s15 = scalar_lea.vmem %s374_s16, 16  ;;  %s1870_s1 = scalar_lea.vmem %s374_s16, 32 }
  0x84   : > { %p1864_p12 = scmp.ne.s32.totalorder %s374_s16, %s1863_s15  ;;  %p1871_p9 = scmp.lt.s32.totalorder %s374_s16, %s374_s16 }
  0x85   : > { %p1872_p2 = scmp.lt.s32.totalorder %s1870_s1, %s1863_s15 }
  0x86   : > { %p1866_p0 = pnand %p1864_p12, %p2616_p11 }
  0x87   : > { %p1873_p4 = por %p1872_p2, %p1871_p9 }
  0x88   : > { %p1867_p5 = pneg %p1866_p0 }
  0x8a   : > { %p1874_p7 = pnand %p1873_p4, %p1867_p5 }
  0x8c   : > { %1877 = shalt.err (!%p1874_p7)
}
  0x8d   : > { %1654 = dma.hbm_to_vmem [thread:$0]  (!%p2617_p1), %s2561_s8, 16, %s374_s16, [#allocation15]  }
  0x8e   : > { %s2318_s28 = scalar_lea.hbm %s2553_s0, %s2223_s26  ;;  %s394_s13 = scalar_lea.vmem [#allocation5], %s2220_s29 }
  0x8f   : > { %s402_s10 = sshll.u32 %s394_s13, 4  ;;  %s2620_s30 = sand.u32 1, %s2020_s19   ;;  %s403_s10 = int_to_ptr.vmem [resolvable:$true] %s402_s10 }
  0x90   : > { %s391_s22 = scalar_lea.sflag [#allocation6], %s2620_s30  ;;  %s1878_s12 = scalar_lea.hbm %s2318_s28, 128 }
  0x91   : > { %p1879_p7 = scmp.ne.s32.totalorder %s2318_s28, %s1878_s12  ;;  %p2621_p11 = scmp.ne.s32.totalorder %s2615_s3, 0 }
  0x92   : > { %s1883_s11 = scalar_lea.hbm %s2553_s0, 256  ;;  %p1884_p1 = scmp.lt.u32.totalorder %s2318_s28, %s2553_s0 }
  0x93   : > { %p1881_p3 = pnand %p1879_p7, %p2621_p11  ;;  %p1885_p10 = scmp.lt.u32.totalorder %s1883_s11, %s1878_s12 }
  0x94   : > { %p1887_p8 = scmp.lt.u32.totalorder %s1878_s12, %s2318_s28 }
  0x95   : > { %p1882_p13 = pneg %p1881_p3  ;;  %p1886_p6 = por %p1885_p10, %p1884_p1 }
  0x97   : > { %p1888_p12 = por %p1887_p8, %p1886_p6 }
  0x99   : > { %p1889_p0 = pnand %p1888_p12, %p1882_p13 }
  0x9b   : > { %1892 = shalt.err (!%p1889_p0)
}
  0x9c   : > { %s1893_s1 = scalar_lea.vmem %s403_s10, 128  ;;  %s2040_s9 = smov [#allocation5]  }
  0x9d   : > { %p1894_p5 = scmp.ne.s32.totalorder %s403_s10, %s1893_s1  ;;  %s1898_s21 = sshll.u32 %s2040_s9, 4  ;;  %s1899_s21 = int_to_ptr.vmem [resolvable:$false] %s1898_s21 }
  0x9e   : > { %s1900_s4 = scalar_lea.vmem %s1899_s21, 256  ;;  %p1901_p4 = scmp.lt.s32.totalorder %s403_s10, %s1899_s21 }
  0x9f   : > { %p1896_p9 = pnand %p1894_p5, %p2621_p11  ;;  %p1902_p7 = scmp.lt.s32.totalorder %s1900_s4, %s1893_s1 }
  0xa1   : > { %p1897_p2 = pneg %p1896_p9  ;;  %p1903_p3 = por %p1902_p7, %p1901_p4 }
  0xa3   : > { %p1904_p1 = pnand %p1903_p3, %p1897_p2 }
  0xa5   : > { %1907 = shalt.err (!%p1904_p1)
}
  0xa6   : > { %p2622_p10 = scmp.ne.s32.totalorder %s2613_s14, 0  ;;  %s2344_s30 = scalar_lea.hbm %s2555_s2, %s2223_s26 }
  0xa7   : > { %s431_s12 = scalar_lea.vmem [#allocation10], %s2220_s29  ;;  %s1908_s17 = scalar_lea.hbm %s2344_s30, 128 }
  0xa8   : > { %1658 = dma.hbm_to_vmem [thread:$0]  (!%p2622_p10), %s2318_s28, 128, %s403_s10, %s391_s22  }
  0xa9   : > { %s438_s16 = sshll.u32 %s431_s12, 4  ;;  %p1909_p13 = scmp.ne.s32.totalorder %s2344_s30, %s1908_s17  ;;  %s439_s16 = int_to_ptr.vmem [resolvable:$true] %s438_s16 }
  0xaa   : > { %s1913_s28 = scalar_lea.hbm %s2555_s2, 256  ;;  %p1914_p12 = scmp.lt.u32.totalorder %s2344_s30, %s2555_s2 }
  0xab   : > { %p1911_p6 = pnand %p1909_p13, %p2621_p11  ;;  %p1915_p0 = scmp.lt.u32.totalorder %s1913_s28, %s1908_s17 }
  0xac   : > { %p1917_p9 = scmp.lt.u32.totalorder %s1908_s17, %s2344_s30 }
  0xad   : > { %p1912_p8 = pneg %p1911_p6  ;;  %p1916_p5 = por %p1915_p0, %p1914_p12 }
  0xaf   : > { %p1918_p2 = por %p1917_p9, %p1916_p5 }
  0xb1   : > { %p1919_p4 = pnand %p1918_p2, %p1912_p8 }
  0xb3   : > { %1922 = shalt.err (!%p1919_p4)
}
  0xb4   : > { %s1923_s29 = scalar_lea.vmem %s439_s16, 128  ;;  %s2041_s26 = smov [#allocation10]  }
  0xb5   : > { %p1924_p7 = scmp.ne.s32.totalorder %s439_s16, %s1923_s29  ;;  %s1928_s15 = sshll.u32 %s2041_s26, 4  ;;  %s1929_s15 = int_to_ptr.vmem [resolvable:$false] %s1928_s15 }
  0xb6   : > { %s1930_s1 = scalar_lea.vmem %s1929_s15, 256  ;;  %p1931_p13 = scmp.lt.s32.totalorder %s439_s16, %s1929_s15 }
  0xb7   : > { %p1926_p3 = pnand %p1924_p7, %p2621_p11  ;;  %p1932_p6 = scmp.lt.s32.totalorder %s1930_s1, %s1923_s29 }
  0xb9   : > { %p1927_p1 = pneg %p1926_p3  ;;  %p1933_p10 = por %p1932_p6, %p1931_p13 }
  0xbb   : > { %p1934_p0 = pnand %p1933_p10, %p1927_p1 }
  0xbd   : > { %1937 = shalt.err (!%p1934_p0)
}
  0xbe   : > { %p2623_p12 = scmp.ne.s32.totalorder %s2613_s14, 0  ;;  %p2624_p8 = scmp.ne.s32.totalorder %s2604_s27, 0 }
  0xbf   : > { %s2368_s3 = sand.u32 (!%p2624_p8), 1, %s2016_s18   ;;  %p2625_p11 = scmp.ne.s32.totalorder (!%p2624_p8), %s2601_s25, 0 }
  0xc0   : > { %1664 = dma.hbm_to_vmem [thread:$0]  (!%p2623_p12), %s2344_s30, 128, %s439_s16, %s2244_s24  }
  0xc1   : > { %447 = sbr.rel (%p2624_p8) target bundleno = 1525 (0x5f5), region = 64  ;;  %s2371_s9 = sshll.u32 (!%p2624_p8), %s2368_s3, 3 }
  0xc2   : > { %s450_s21 = scalar_lea.sflag (!%p2624_p8), [#allocation6], %s2368_s3  ;;  %s453_s4 = scalar_lea.vmem (!%p2624_p8), [#allocation5], %s2371_s9 }
  0xc8   : > { %1991 = dma.done.wait (%p2625_p11), %s450_s21, 128  }
  0xc9   : > { %1993 = vsyncadd (%p2625_p11), %s450_s21, 4294967168  ;;  %s458_s27 = sand.u32 1, %s2142_s23   ;;  %s462_s24 = scalar_lea.vmem [#allocation8], %s2371_s9 }
  0xca   : > { %s459_s14 = scalar_lea.sflag [#allocation9], %s458_s27 }
  0xcb   : > { %1995 = dma.done.wait (%p2625_p11), %s459_s14, 256  }
  0xcc   : > { %1997 = vsyncadd (%p2625_p11), %s459_s14, 4294967040  ;;  %s471_s6 = scalar_lea.vmem [#allocation10], %s2371_s9  ;;  %p2626_p10 = scmp.eq.s32.totalorder %s2142_s23, 0 }
  0xce   : > { %1999 = dma.done.wait (%p2626_p10), [#allocation12], 512   ;;  %p2627_p5 = pmov %p2626_p10 }
  0xd0   : > { %2001 = vsyncadd (%p2627_p5), [#allocation12], 4294966784  ;;  %p2628_p9 = pmov %p2627_p5 }
  0xd1   : > { %p2629_p2 = pmov %p2627_p5 }
  0xd2   : > { %2003 = dma.done.wait (%p2628_p9), [#allocation15], 16  }
  0xd3   : > { %2005 = vsyncadd (%p2629_p2), [#allocation15], 4294967280  ;;  %v2042_v0 = vmov 0.0   ;;  %vm2043_vm0 = vmmov 0   ;;  %v1738_v1 = vld [vmem:[%s2558_s5] sm:$0xff]   ;;  %v1739_v2 = vld [vmem:[%s2558_s5 + $0x8] sm:$0xff]  }
  0xd4   : > { %1545 = vmatprep.subr.bf16.mxu0 %v2042_v0  ;;  %1549 = vmatprep.mubr.msk.bf16.mxu0 %vm2043_vm0, %v2042_v0  ;;  %v537_v3 = vld [vmem:[%s462_s24] sm:$0xff]  ;;  %vm564_vm1 = vcmask 261120   ;;  %v679_v7 = vld [vmem:[%s453_s4] sm:$0xff]  ;;  %s2630_s17 = sld [smem:[#allocation33_spill]]  ;;  %vm675_vm2 = vcmask 257024   ;;  %s2631_s28 = sld [smem:[#allocation32_spill]] }
  0xd5   : > { %1553 = vmatprep.subr.bf16.mxu1 %v2042_v0  ;;  %1557 = vmatprep.mubr.msk.bf16.mxu1 %vm2043_vm0, %v2042_v0  ;;  %v1740_v4 = vld [vmem:[#allocation11] sm:$0xff]   ;;  %v538_v5 = vpack.c.bf16 %v537_v3, %v537_v3  ;;  %v1741_v6 = vld [vmem:[#allocation11 + $0x8] sm:$0xff]   ;;  %v680_v8 = vpack.c.bf16 %v679_v7, %v679_v7  ;;  %v1742_v9 = vld [vmem:[#allocation13] sm:$0xff]   ;;  %vm752_vm3 = vcmask 64512   ;;  %s2044_s10 = smov 112   ;;  %s2045_s22 = smov 120  }
  0xd6   : > { %1546 = vmatpush3.bf16.msra.mxu0 %v1738_v1  ;;  %1554 = vmatpush3.bf16.msra.mxu1 %v1742_v9  ;;  %v1743_v10 = vld [vmem:[#allocation13 + $0x8] sm:$0xff]   ;;  %s2046_s29 = smov 104   ;;  %v1485_v31 = vld [vmem:[#allocation14] ss:$0 sm:$0xff]  ;;  %vm812_vm4 = vcmask 1043456   ;;  %vm859_vm5 = vcmask 60416  }
  0xd7   : > { %1547 = vmatprep.subr.bf16.mxu0 %v2042_v0  ;;  %1555 = vmatprep.subr.bf16.mxu1 %v2042_v0  ;;  %v539_v11 = vld [vmem:[%s471_s6] sm:$0xff]  ;;  %s2047_s26 = smov 8   ;;  %s2632_s21 = sld [smem:[#allocation34_spill]]  ;;  %vm985_vm6 = vcmask 126016   ;;  %vm1104_vm7 = vcmask 191616   ;;  %vm1223_vm8 = vcmask 257216  }
  0xd8   : > { %v540_v12 = vpack.c.bf16 %v539_v11, %v539_v11  ;;  %s2048_s24 = smov 16   ;;  %s2634_s6 = sld [smem:[#allocation23_spill]] }
  0xd9   : > { %s2049_s25 = smov 24   ;;  %s2635_s23 = sld [smem:[#allocation35_spill]] }
  0xda   : > { %1548 = vmatpush3.bf16.msra.mxu0 %v1739_v2  ;;  %1556 = vmatpush3.bf16.msra.mxu1 %v1743_v10  ;;  %v1481_v13 = vld [vmem:[%s2630_s17] ss:$0 sm:$0xff]  ;;  %s2636_s12 = sld [smem:[#allocation28_spill]]  ;;  %s531_s17 = scalar_lea.vmem [#allocation16], %s2371_s9 }
  0xdb   : > { %1561 = vmatprep.subr.bf16.mxu0 %v2042_v0  ;;  %1569 = vmatprep.subr.bf16.mxu1 %v2042_v0  ;;  %v1489_v20 = vld [vmem:[%s2631_s28] ss:$0 sm:$0xff]  ;;  %s1308_s11 = sshll.u32 %s531_s17, 4  ;;  %s2505_s11 = int_to_ptr.vmem [resolvable:$true] %s1308_s11 }
  0xdc   : > { %s1938_s9 = scalar_lea.vmem %s2505_s11, 128 }
  0xdd   : > { %1550 = vmatmul.mubr.msk.bf16.vlgmr.msra.gmra.mrb[0].mxu0 %vm564_vm1, %v538_v5  ;;  %1558 = vmatmul.mubr.msk.bf16.vlgmr.msra.gmra.mrb[0].mxu1 %vm564_vm1, %v540_v12  ;;  %s2633_s4 = smov %s2632_s21  ;;  %p1939_p4 = scmp.ne.s32.totalorder %s2505_s11, %s1938_s9 }
  0xde   : > { %1562 = vmatpush3.bf16.msra.mxu0 %v1740_v4  ;;  %1565 = vmatprep.mubr.msk.bf16.mxu0 %vm2043_vm0, %v2042_v0  ;;  %s1511_s16 = sshll.u32 %s2634_s6, 7 }
  0xdf   : > { %1563 = vmatprep.subr.bf16.mxu0 %v2042_v0  ;;  %1571 = vmatprep.mubr.msk.bf16.mxu1 %vm2043_vm0, %v2042_v0 }
  0xe0   : > { %p2638_p7 = scmp.ne.s32.totalorder %s2636_s12, 0 }
  0xe2   : > { %1564 = vmatpush3.bf16.msra.mxu0 %v1741_v6  ;;  %p1940_p3 = pnand %p1939_p4, %p2638_p7 }
  0xe3   : > { %1575 = vmatprep.subr.bf16.mxu0 %v2042_v0 }
  0xe4   : > { %p1941_p1 = pneg %p1940_p3 }
  0xe5   : > { %1566 = vmatmul.mubr.msk.bf16.vlgmr.msra.gmra.mrb[4].mxu0 %vm564_vm1, %v680_v8 }
  0xe6   : > { %1577 = vmatprep.mubr.msk.bf16.mxu0 %vm2043_vm0, %v2042_v0 }
 0x1b0   : > { %v602_v14 = vpop.f32.mrb[0].mxu0  ;;  %v668_v32 = vpop.f32.mrb[0].mxu1 }
 0x1b1   : > { %v603_v15 = vadd.f32 %v1481_v13, %v602_v14  ;;  %v1551_v16 = vpop.f32.mrb[1].mxu0  ;;  %v669_v33 = vadd.f32 %v1485_v31, %v668_v32  ;;  %v1559_v34 = vpop.f32.mrb[1].mxu1 }
 0x1b2   : > { %v605_v17 = vpop.f32.mrb[2].mxu0  ;;  %v671_v35 = vpop.f32.mrb[2].mxu1 }
 0x1b3   : > { %v674_v18 = vpack.c.bf16 %v603_v15, %v603_v15  ;;  %v1552_v19 = vpop.f32.mrb[3].mxu0  ;;  %v677_v36 = vpack.c.bf16 %v669_v33, %v669_v33  ;;  %v1560_v37 = vpop.f32.mrb[3].mxu1 }
 0x1b5   : > { %676 = vst.msk [vmem:[#allocation2] sm:$0xf] %vm675_vm2, %v674_v18  ;;  %678 = vst.msk [vmem:[#allocation3] sm:$0xf] %vm675_vm2, %v677_v36 }
 0x1b8   : > { %v742_v21 = vpop.f32.mrb[4].mxu0 }
 0x1b9   : > { %v743_v22 = vadd.f32 %v1489_v20, %v742_v21  ;;  %v1567_v23 = vpop.f32.mrb[5].mxu0 }
 0x1ba   : > { %v745_v24 = vpop.f32.mrb[6].mxu0 }
 0x1bb   : > { %v748_v25 = vmul.f32 0.35355338, %v743_v22  ;;  %v1568_v26 = vpop.f32.mrb[7].mxu0 }
 0x1bc   : > { %v750_v27 = vld [vmem:[#allocation2] sm:$0xf]  ;;  %v751_v38 = vld [vmem:[#allocation3] sm:$0xf] }
 0x1bd   : > { %v757_v28 = vsel %vm752_vm3, %v750_v27, 0  ;;  %v1495_v29 = vcombine.low %v750_v27, %v750_v27  ;;  %v749_v30 = vpack.c.bf16 %v748_v25, %v748_v25  ;;  %v814_v39 = vsel %vm812_vm4, %v751_v38, 0 }
 0x1be   : > { %1570 = vmatpush3.bf16.xpose.msra.mxu1 %v757_v28  ;;  %1576 = vmatpush3.bf16.msra.mxu0 %v814_v39  ;;  %v1497_v4 = vcombine.low %v751_v38, %v751_v38 }
 0x1bf   : > { %989 = vrot.lane.b32.xlu1 %v1495_v29, %s2044_s10  ;;  %867 = vrot.lane.b32.xlu0 %v1495_v29, %s2045_s22 }
 0x1c0   : > { %1581 = vmatprep.subr.bf16.mxu1 %v2042_v0  ;;  %1587 = vmatprep.subr.bf16.mxu0 %v2042_v0 }
 0x1c3   : > { %987 = vrot.lane.b32.xlu1 %v749_v30, %s2044_s10  ;;  %862 = vrot.lane.b32.xlu0 %v749_v30, %s2045_s22 }
 0x1c5   : > { %1572 = vmatmul.mubr.msk.bf16.vlgmr.msra.gmra.mrb[4].mxu1 %vm752_vm3, %v749_v30 }
 0x1c6   : > { %1583 = vmatprep.mubr.msk.bf16.mxu1 %vm2043_vm0, %v2042_v0 }
 0x1c7   : > { %1106 = vrot.lane.b32.xlu1 %v749_v30, %s2046_s29  ;;  %1108 = vrot.lane.b32.xlu0 %v1495_v29, %s2046_s29 }
 0x231   : > { %v868_v40 = vpop.permute.xlu0 %867  ;;  %v990_v42 = vpop.permute.xlu1 %989 }
 0x232   : > { %v873_v41 = vsel %vm752_vm3, %v868_v40, 0  ;;  %v995_v44 = vsel %vm752_vm3, %v990_v42, 0 }
 0x233   : > { %1582 = vmatpush3.bf16.xpose.msra.mxu1 %v873_v41 }
 0x234   : > { %1593 = vmatprep.subr.bf16.mxu1 %v2042_v0 }
 0x235   : > { %v863_v43 = vpop.permute.xlu0 %862  ;;  %v988_v46 = vpop.permute.xlu1 %987 }
 0x239   : > { %v1109_v45 = vpop.permute.xlu0 %1108  ;;  %v1107_v48 = vpop.permute.xlu1 %1106 }
 0x23a   : > { %1584 = vmatmul.mubr.msk.bf16.vlgmr.msra.gmra.mrb[8].mxu1 %vm752_vm3, %v863_v43  ;;  %v1114_v47 = vsel %vm752_vm3, %v1109_v45, 0 }
 0x23b   : > { %1594 = vmatpush3.bf16.xpose.msra.mxu1 %v995_v44  ;;  %1595 = vmatprep.mubr.msk.bf16.mxu1 %vm2043_vm0, %v2042_v0 }
 0x23c   : > { %1605 = vmatprep.subr.bf16.mxu1 %v2042_v0 }
 0x242   : > { %1596 = vmatmul.mubr.msk.bf16.vlgmr.msra.gmra.mrb[12].mxu1 %vm752_vm3, %v988_v46 }
 0x243   : > { %1606 = vmatpush3.bf16.xpose.msra.mxu1 %v1114_v47  ;;  %1607 = vmatprep.mubr.msk.bf16.mxu1 %vm2043_vm0, %v2042_v0 }
 0x244   : > { %1617 = vmatprep.subr.bf16.mxu1 %v2042_v0 }
 0x24a   : > { %1608 = vmatmul.mubr.msk.bf16.vlgmr.msra.gmra.mrb[16].mxu1 %vm752_vm3, %v1107_v48 }
 0x24b   : > { %1621 = vmatprep.mubr.msk.bf16.mxu1 %vm2043_vm0, %v2042_v0 }
 0x298   : > { %v793_v49 = vpop.f32.mrb[4].mxu1 }
 0x299   : > { %v1573_v50 = vpop.f32.mrb[5].mxu1  ;;  %v799_v51 = vsel %vm752_vm3, %v793_v49, -inf }
 0x29a   : > { %800 = vmax.xlane.f32.xlu0 %v799_v51  ;;  %v796_v52 = vpop.f32.mrb[6].mxu1 }
 0x29b   : > { %v1574_v53 = vpop.f32.mrb[7].mxu1 }
 0x30d   : > { %v909_v54 = vpop.f32.mrb[8].mxu1 }
 0x30e   : > { %v1585_v55 = vpop.f32.mrb[9].mxu1  ;;  %v915_v56 = vsel %vm752_vm3, %v909_v54, -inf }
 0x30f   : > { %916 = vmax.xlane.f32.xlu1 %v915_v56  ;;  %v912_v57 = vpop.f32.mrb[10].mxu1 }
 0x310   : > { %v1586_v58 = vpop.f32.mrb[11].mxu1  ;;  %v1746_v57 = vld [vmem:[%s2632_s21] sm:$0xff]  }
 0x311   : > { %1618 = vmatpush3.bf16.msra.mxu1 %v1746_v57 }
 0x312   : > { %1619 = vmatprep.subr.bf16.mxu1 %v2042_v0 }
 0x315   : > { %v1031_v59 = vpop.f32.mrb[12].mxu1 }
 0x316   : > { %v1597_v60 = vpop.f32.mrb[13].mxu1  ;;  %v1037_v61 = vsel %vm752_vm3, %v1031_v59, -inf }
 0x317   : > { %1038 = vmax.xlane.f32.xlu0 %v1037_v61  ;;  %v1034_v62 = vpop.f32.mrb[14].mxu1  ;;  %v1747_v61 = vld [vmem:[%s2633_s4 + $0x8] sm:$0xff]  }
 0x318   : > { %v1598_v63 = vpop.f32.mrb[15].mxu1  ;;  %1620 = vmatpush3.bf16.msra.mxu1 %v1747_v61 }
 0x31d   : > { %v1150_v1 = vpop.f32.mrb[16].mxu1 }
 0x31e   : > { %v1609_v2 = vpop.f32.mrb[17].mxu1  ;;  %v1156_v3 = vsel %vm752_vm3, %v1150_v1, -inf }
 0x31f   : > { %1157 = vmax.xlane.f32.xlu0 %v1156_v3  ;;  %v1153_v5 = vpop.f32.mrb[18].mxu1 }
 0x320   : > { %928 = vrot.lane.b32.xlu1 %v1497_v4, %s2045_s22  ;;  %v1610_v6 = vpop.f32.mrb[19].mxu1 }
 0x324   : > { %1166 = vrot.lane.b32.xlu1 %v1497_v4, %s2046_s29  ;;  %s1294_s29 = scalar_lea.sflag [#allocation7], %s2368_s3 }
 0x327   : > { %v801_v7 = vpop.xlane.xlu0 %800 }
 0x328   : > { %v802_v8 = vsub.f32 %v793_v49, %v801_v7 }
 0x32a   : > { %v803_v9 = vmul.f32 1.442695, %v802_v8 }
 0x32c   : > { %1748 = vpow2.f32 %v803_v9 }
 0x335   : > { %1047 = vrot.lane.b32.xlu0 %v1497_v4, %s2044_s10  ;;  %s2637_s10 = sld [smem:[#allocation36_spill]] }
 0x336   : > { %v1749_v10 = vpop.eup %1748 }
 0x337   : > { %v808_v11 = vpack.c.bf16 %v1749_v10, %v1749_v10  ;;  %v805_v27 = vsel %vm752_vm3, %v1749_v10, 0.0 }
 0x339   : > { %1578 = vmatmul.mubr.msk.bf16.vlgmr.msra.gmra.mrb[8].mxu0 %vm752_vm3, %v808_v11  ;;  %v1506_v11 = vld [vmem:[%s2635_s23] ss:$0 sm:$0xff] }
 0x33a   : > { %1589 = vmatprep.mubr.msk.bf16.mxu0 %vm2043_vm0, %v2042_v0 }
 0x33b   : > { %s2503_s22 = scalar_lea.hbm %s2637_s10, %s1511_s16 }
 0x39c   : > { %v917_v12 = vpop.xlane.xlu1 %916 }
 0x39d   : > { %v918_v13 = vsub.f32 %v909_v54, %v917_v12 }
 0x39f   : > { %v919_v14 = vmul.f32 1.442695, %v918_v13 }
 0x3a0   : > { %v929_v15 = vpop.permute.xlu1 %928 }
 0x3a1   : > { %1750 = vpow2.f32 %v919_v14  ;;  %v934_v16 = vsel %vm812_vm4, %v929_v15, 0 }
 0x3a2   : > { %1588 = vmatpush3.bf16.msra.mxu0 %v934_v16 }
 0x3a3   : > { %1599 = vmatprep.subr.bf16.mxu0 %v2042_v0 }
 0x3a4   : > { %v1039_v17 = vpop.xlane.xlu0 %1038  ;;  %v1167_v30 = vpop.permute.xlu1 %1166 }
 0x3a5   : > { %v1040_v18 = vsub.f32 %v1031_v59, %v1039_v17  ;;  %v1172_v33 = vsel %vm812_vm4, %v1167_v30, 0 }
 0x3a7   : > { %v1041_v19 = vmul.f32 1.442695, %v1040_v18 }
 0x3a9   : > { %1752 = vpow2.f32 %v1041_v19 }
 0x3ab   : > { %v1751_v20 = vpop.eup %1750 }
 0x3ac   : > { %v1158_v21 = vpop.xlane.xlu0 %1157  ;;  %v921_v22 = vsel %vm752_vm3, %v1751_v20, 0.0  ;;  %v924_v23 = vpack.c.bf16 %v1751_v20, %v1751_v20 }
 0x3ad   : > { %v1159_v24 = vsub.f32 %v1150_v1, %v1158_v21  ;;  %922 = vadd.xlane.f32.xlu1 %v921_v22 }
 0x3ae   : > { %1590 = vmatmul.mubr.msk.bf16.vlgmr.msra.gmra.mrb[12].mxu0 %vm752_vm3, %v924_v23 }
 0x3af   : > { %v1160_v25 = vmul.f32 1.442695, %v1159_v24  ;;  %1601 = vmatprep.mubr.msk.bf16.mxu0 %vm2043_vm0, %v2042_v0 }
 0x3b0   : > { %v1048_v26 = vpop.permute.xlu0 %1047 }
 0x3b1   : > { %1754 = vpow2.f32 %v1160_v25  ;;  %v1053_v28 = vsel %vm812_vm4, %v1048_v26, 0  ;;  %806 = vadd.xlane.f32.xlu1 %v805_v27 }
 0x3b2   : > { %1600 = vmatpush3.bf16.msra.mxu0 %v1053_v28 }
 0x3b3   : > { %v1753_v29 = vpop.eup %1752  ;;  %1611 = vmatprep.subr.bf16.mxu0 %v2042_v0 }
 0x3b4   : > { %v1043_v31 = vsel %vm752_vm3, %v1753_v29, 0.0  ;;  %v1046_v32 = vpack.c.bf16 %v1753_v29, %v1753_v29 }
 0x3b5   : > { %1044 = vadd.xlane.f32.xlu0 %v1043_v31 }
 0x3b6   : > { %1602 = vmatmul.mubr.msk.bf16.vlgmr.msra.gmra.mrb[16].mxu0 %vm752_vm3, %v1046_v32 }
 0x3b7   : > { %1612 = vmatpush3.bf16.msra.mxu0 %v1172_v33  ;;  %1613 = vmatprep.mubr.msk.bf16.mxu0 %vm2043_vm0, %v2042_v0 }
 0x3bb   : > { %v1755_v34 = vpop.eup %1754 }
 0x3bc   : > { %v1162_v35 = vsel %vm752_vm3, %v1755_v34, 0.0  ;;  %v1165_v36 = vpack.c.bf16 %v1755_v34, %v1755_v34 }
 0x3bd   : > { %1163 = vadd.xlane.f32.xlu0 %v1162_v35 }
 0x3be   : > { %1614 = vmatmul.mubr.msk.bf16.vlgmr.msra.gmra.mrb[20].mxu0 %vm752_vm3, %v1165_v36 }
 0x40c   : > { %v850_v37 = vpop.f32.mrb[8].mxu0 }
 0x40d   : > { %v1579_v38 = vpop.f32.mrb[9].mxu0 }
 0x40e   : > { %v853_v39 = vpop.f32.mrb[10].mxu0 }
 0x40f   : > { %v1580_v40 = vpop.f32.mrb[11].mxu0 }
 0x43a   : > { %v923_v41 = vpop.xlane.xlu1 %922 }
 0x43e   : > { %v807_v42 = vpop.xlane.xlu1 %806 }
 0x43f   : > { %1756 = vrcp.f32 %v807_v42 }
 0x440   : > { %1758 = vrcp.f32 %v923_v41 }
 0x442   : > { %v1045_v46 = vpop.xlane.xlu0 %1044 }
 0x443   : > { %1760 = vrcp.f32 %v1045_v46 }
 0x449   : > { %v1757_v43 = vpop.eup %1756 }
 0x44a   : > { %v857_v44 = vmul.f32 %v1757_v43, %v850_v37  ;;  %v1759_v47 = vpop.eup %1758  ;;  %v1164_v52 = vpop.xlane.xlu0 %1163 }
 0x44b   : > { %1762 = vrcp.f32 %v1164_v52 }
 0x44c   : > { %v858_v45 = vpack.c.bf16 %v857_v44, %v857_v44 }
 0x44d   : > { %v1761_v55 = vpop.eup %1760 }
 0x44e   : > { %860 = vst.msk [vmem:[#allocation4] sm:$0xf] %vm859_vm5, %v858_v45 }
 0x455   : > { %v1763_v1 = vpop.eup %1762 }
 0x481   : > { %v970_v48 = vpop.f32.mrb[12].mxu0 }
 0x482   : > { %v977_v49 = vmul.f32 %v1759_v47, %v970_v48  ;;  %v1591_v50 = vpop.f32.mrb[13].mxu0 }
 0x483   : > { %v973_v51 = vpop.f32.mrb[14].mxu0 }
 0x484   : > { %v1514_v53 = vpack.c.bf16 %v977_v49, %v977_v49  ;;  %v1592_v54 = vpop.f32.mrb[15].mxu0 }
 0x486   : > { %982 = vrot.lane.b32.xlu0 %v1514_v53, %s2047_s26  ;;  %s2050_s26 = smov [#allocation16]  }
 0x487   : > { %s1942_s15 = sshll.u32 %s2050_s26, 4  ;;  %s1943_s15 = int_to_ptr.vmem [resolvable:$false] %s1942_s15 }
 0x488   : > { %s1944_s1 = scalar_lea.vmem %s1943_s15, 256  ;;  %p1945_p13 = scmp.lt.s32.totalorder %s2505_s11, %s1943_s15 }
 0x489   : > { %v1089_v56 = vpop.f32.mrb[16].mxu0  ;;  %p1946_p6 = scmp.lt.s32.totalorder %s1944_s1, %s1938_s9 }
 0x48a   : > { %v1096_v58 = vmul.f32 %v1761_v55, %v1089_v56  ;;  %v1603_v59 = vpop.f32.mrb[17].mxu0 }
 0x48b   : > { %v1092_v60 = vpop.f32.mrb[18].mxu0  ;;  %p1947_p0 = por %p1946_p6, %p1945_p13 }
 0x48c   : > { %v1515_v62 = vpack.c.bf16 %v1096_v58, %v1096_v58  ;;  %v1604_v63 = vpop.f32.mrb[19].mxu0 }
 0x48d   : > { %p1948_p12 = pnand %p1947_p0, %p1941_p1 }
 0x48e   : > { %1101 = vrot.lane.b32.xlu1 %v1515_v62, %s2048_s24 }
 0x491   : > { %v1208_v2 = vpop.f32.mrb[20].mxu0 }
 0x492   : > { %v1215_v3 = vmul.f32 %v1763_v1, %v1208_v2  ;;  %v1615_v4 = vpop.f32.mrb[21].mxu0 }
 0x493   : > { %v1211_v5 = vpop.f32.mrb[22].mxu0 }
 0x494   : > { %v1516_v6 = vpack.c.bf16 %v1215_v3, %v1215_v3  ;;  %v1616_v7 = vpop.f32.mrb[23].mxu0 }
 0x496   : > { %1220 = vrot.lane.b32.xlu1 %v1516_v6, %s2049_s25 }
 0x4f8   : > { %v983_v8 = vpop.permute.xlu0 %982 }
 0x4f9   : > { %986 = vst.msk [vmem:[#allocation4] sm:$0xf] %vm985_vm6, %v983_v8 }
 0x500   : > { %v1102_v9 = vpop.permute.xlu1 %1101 }
 0x501   : > { %1105 = vst.msk [vmem:[#allocation4] sm:$0xf] %vm1104_vm7, %v1102_v9 }
 0x508   : > { %v1221_v0 = vpop.permute.xlu1 %1220 }
 0x509   : > { %1224 = vst.msk [vmem:[#allocation4] sm:$0xf] %vm1223_vm8, %v1221_v0 }
 0x510   : > { %v1225_v10 = vld [vmem:[#allocation4] sm:$0xf] }
 0x511   : > { %1622 = vmatmul.mubr.msk.bf16.vlgmr.msra.gmra.mrb[20].mxu1 %vm564_vm1, %v1225_v10 }
 0x5e4   : > { %v1286_v12 = vpop.f32.mrb[20].mxu1 }
 0x5e5   : > { %v1287_v13 = vadd.f32 %v1506_v11, %v1286_v12  ;;  %v1623_v14 = vpop.f32.mrb[21].mxu1 }
 0x5e6   : > { %v1289_v15 = vpop.f32.mrb[22].mxu1 }
 0x5e7   : > { %v1624_v16 = vpop.f32.mrb[23].mxu1  ;;  %1292 = vst.msk [vmem:[%s531_s17] sm:$0xff] %vm564_vm1, %v1287_v13 }
 0x5e8   : > { %1951 = shalt.err (!%p1948_p12)
}
 0x5e9   : > { %s1952_s3 = scalar_lea.hbm %s2503_s22, 128  ;;  %s1956_s14 = scalar_lea.hbm %s2637_s10, 256 }
 0x5ea   : > { %p1953_p8 = scmp.ne.s32.totalorder %s2503_s22, %s1952_s3  ;;  %p1957_p5 = scmp.lt.u32.totalorder %s2503_s22, %s2637_s10 }
 0x5eb   : > { %p1958_p9 = scmp.lt.u32.totalorder %s1956_s14, %s1952_s3  ;;  %p1960_p4 = scmp.lt.u32.totalorder %s1952_s3, %s2503_s22 }
 0x5ec   : > { %p1954_p11 = pnand %p1953_p8, %p2638_p7 }
 0x5ed   : > { %p1959_p2 = por %p1958_p9, %p1957_p5 }
 0x5ee   : > { %p1955_p10 = pneg %p1954_p11 }
 0x5ef   : > { %p1961_p3 = por %p1960_p4, %p1959_p2 }
 0x5f1   : > { %p1962_p1 = pnand %p1961_p3, %p1955_p10 }
 0x5f3   : > { %1965 = shalt.err (!%p1962_p1)
}
 0x5f4   : > { %1643 = dma.vmem_to_hbm [thread:$0]  (%p2638_p7), %s2505_s11, 128, %s2503_s22, %s1294_s29  }
 0x5f5 PF: > { %s2639_s25 = sld [smem:[#allocation22_spill]]  ;;  %s2640_s13 = sld [smem:[#allocation26_spill]] }
 0x5f6   : > { %s2641_s30 = sld [smem:[#allocation25_spill]] }
 0x5fb   : > { %s1320_s23 = sand.u32 1, %s2639_s25   ;;  %p2642_p13 = scmp.ne.s32.totalorder %s2640_s13, 0 }
 0x5fc   : > { %p2643_p6 = scmp.ge.s32.totalorder %s2641_s30, 2  ;;  %s1321_s16 = scalar_lea.sflag [#allocation7], %s1320_s23 }
 0x5fe   : > { %p1666_p0 = pnand %p2643_p6, %p2642_p13 }
 0x600   : > { %2007 = dma.done.wait (!%p1666_p0), %s1321_s16, 128  }
 0x601   : > { %2009 = vsyncadd (!%p1666_p0), %s1321_s16, 4294967168  ;;  %s32_s22 = sadd.s32 1, %s2641_s30   ;;  %s2644_s12 = sld [smem:[#allocation29_spill]] }
 0x602   : > { %p29_p12 = scmp.ge.s32.totalorder %s32_s22, 4   ;;  %s2645_s20 = sld [smem:[#allocation24_spill]] }
 0x603   : > { %s2646_s21 = sld [smem:[#allocation27_spill]]  ;;  %s2647_s17 = smov %s2016_s18 }
 0x604   : > { %s2648_s18 = smov %s2020_s19  ;;  %31 = sbr.rel (!%p29_p12) target bundleno = 18 (0x12), region = 149 }
 0x607   : > { %s2649_s19 = smov %s2644_s12 }
 0x60b   :  { %1326 = vsyncpa [#allocation6], 1 }
 0x60c   :  { %1328 = vsyncpa [#allocation6 + $0x1], 1 }
 0x60d   :  { %1329 = vsyncpa [#allocation9], 1 }
 0x60e   :  { %1331 = vsyncpa [#allocation9 + $0x1], 1 }
 0x60f   :  { %1332 = vsyncpa [#allocation12], 1 }
 0x610   :  { %1333 = vsyncpa [#allocation15], 1 }
 0x611   :  { %1334 = vsyncpa [#allocation7], 1 }
 0x612   :  { %1336 = vsyncpa [#allocation7 + $0x1], 1 }

</bundles_post_ra>
